<compile_context>
chip_gen: v5e
topology: v5e:2x2
jax: 0.10.0
libtpu: 0.0.40
codegen_flags: <defaults>
</compile_context>

<pallas_src>
import jax
import jax.numpy as jnp
from jax import lax
from jax.experimental import pallas as pl
from jax.experimental.pallas import tpu as pltpu


def _round_up(x, m):
    return ((x + m - 1) // m) * m


def _noise_tail_kernel(true_ref, noise_ref, w_ref, out_ref):
    # true_ref / noise_ref / out_ref: (TN, Dp) lane-dense tiles; w_ref: (Dp, Dp).
    fake = true_ref[...] + noise_ref[...]
    # Contract last dims of both operands (== fake @ W.T for torch (out, in) W);
    # avoids any wrapper-side transpose of the weight.
    out_ref[...] = lax.dot_general(
        fake, w_ref[...],
        dimension_numbers=(((1,), (1,)), ((), ())),
        preferred_element_type=jnp.float32,
    ).astype(out_ref.dtype)


def noise_generator_forward(true_feats, tail_w, noise):
    """true_feats: (N, D); tail_w: (D, D) torch layout (out, in); noise: (N, D)."""
    N, D = true_feats.shape
    dtype = true_feats.dtype

    # ---- lane-dense packing factor ----------------------------------------
    if D % 128 == 0:
        R = 1                       # already lane-dense
    elif 128 % D == 0:
        R = 128 // D                # pack R feature rows per 128-lane row
    else:
        R = 1                       # fallback: block last dim == full D (lane-sparse)
    Dp = D * R

    # Block-diagonal weight: packing R rows per vreg row turns the per-row
    # y = x @ W.T into one lane-dense (TN, Dp) x (Dp, Dp) MXU contraction.
    w_big = jnp.kron(jnp.eye(R, dtype=tail_w.dtype), tail_w)          # (Dp, Dp)

    # ---- batch tiling -------------------------------------------------------
    n_pack = -(-N // R)                                # packed rows needed
    TN = min(1024, _round_up(max(n_pack, 1), 8))       # big tiles: ~85%+ of HBM roofline
    if n_pack >= 16:                                   # >= 2 grid steps -> both TCs busy (v7x)
        TN = min(TN, _round_up(-(-n_pack // 2), 8))
    np_pad = _round_up(n_pack, TN)
    n_pad = np_pad * R

    def pack(x):
        if n_pad != N:
            x = jnp.pad(x, ((0, n_pad - N), (0, 0)))
        return x.reshape(np_pad, Dp)                   # row-major flat reinterpret

    true_p = pack(true_feats)
    noise_p = pack(noise)

    itemsize = jnp.dtype(dtype).itemsize
    cost = pl.CostEstimate(
        flops=2 * np_pad * Dp * Dp + np_pad * Dp,
        transcendentals=0,
        bytes_accessed=(3 * np_pad * Dp + Dp * Dp) * itemsize,
    )

    out_p = pl.pallas_call(
        _noise_tail_kernel,
        out_shape=jax.ShapeDtypeStruct((np_pad, Dp), dtype),
        grid_spec=pltpu.PrefetchScalarGridSpec(
            num_scalar_prefetch=0,
            grid=(np_pad // TN,),
            in_specs=[
                pl.BlockSpec((TN, Dp), lambda i: (i, 0)),    # true feature tile
                pl.BlockSpec((TN, Dp), lambda i: (i, 0)),    # selected-noise tile
                pl.BlockSpec((Dp, Dp), lambda i: (0, 0)),    # weight (resident)
            ],
            out_specs=pl.BlockSpec((TN, Dp), lambda i: (i, 0)),
        ),
        compiler_params=pltpu.CompilerParams(
            dimension_semantics=("parallel",),
            vmem_limit_bytes=32 * 1024 * 1024,   # explicit; safe on v5e/v6e/v7x
        ),
        cost_estimate=cost,
    )(true_p, noise_p, w_big)

    return out_p.reshape(n_pad, D)[:N]


def generate_mix_noise(key, shape, mix_noise, noise_std):
    """Distribution-equivalent collapse of torch's draw-K-then-one-hot-select:
    draw ONE (N, D) normal and scale each row by the std of its sampled mixture
    component. (Not bit-identical to drawing K tensors and selecting one.)"""
    N, D = shape
    k_idx, k_n = jax.random.split(key)
    idxs = jax.random.randint(k_idx, (N,), 0, mix_noise)
    stds = noise_std * (1.1 ** jnp.arange(mix_noise, dtype=jnp.float32))
    return jax.random.normal(k_n, (N, D), dtype=jnp.float32) * stds[idxs][:, None]


if __name__ == "__main__":
    # Small shapes consistent with the module: batch N=16, in_planes D=32,
    # mix_noise K=3, noise_std=0.015.
    N, D, K = 16, 32, 3
    noise_std = 0.015

    key = jax.random.PRNGKey(0)
    k_feat, k_w, k_noise = jax.random.split(key, 3)

    true_feats = jax.random.normal(k_feat, (N, D), dtype=jnp.float32)

    # Deterministic xavier-normal init of the bias-free tail Linear, torch (out, in) layout.
    xavier_std = (2.0 / (D + D)) ** 0.5
    tail_w = jax.random.normal(k_w, (D, D), dtype=jnp.float32) * xavier_std

    # RNG glue (mirrors torch.randint / torch.normal / one_hot, collapsed to one draw).
    noise = generate_mix_noise(k_noise, (N, D), K, noise_std)

    out = noise_generator_forward(true_feats, tail_w, noise)
    out = jax.block_until_ready(out)

    # Pure-JAX reference of the same forward pass (same pre-selected noise).
    ref = (true_feats + noise) @ tail_w.T

    assert out.shape == (N, D)
    assert jnp.allclose(out, ref, atol=1e-4, rtol=1e-4), "mismatch vs JAX reference"
    print("KERNEL_OK")
</pallas_src>

<mosaic_0001>
module attributes {stable_mosaic.version = 11 : i64} {
  func.func @_noise_tail_kernel(%arg0: i32, %arg1: memref<8x128xf32, #tpu.memory_space<vmem>>, %arg2: memref<8x128xf32, #tpu.memory_space<vmem>>, %arg3: memref<128x128xf32, #tpu.memory_space<vmem>>, %arg4: memref<8x128xf32, #tpu.memory_space<vmem>>) attributes {dimension_semantics = [#tpu.dimension_semantics<parallel>], iteration_bounds = array<i64: 1>, scalar_prefetch = 0 : i64, scratch_operands = 0 : i64, tpu.core_type = #tpu.core_type<tc>, window_params = [{transform_indices = @transform_0, window_bounds = array<i64: 8, 128>}, {transform_indices = @transform_1, window_bounds = array<i64: 8, 128>}, {pipeline_mode = #tpu.pipeline_mode<synchronous>, transform_indices = @transform_2, window_bounds = array<i64: 128, 128>}, {transform_indices = @transform_3, window_bounds = array<i64: 8, 128>}]} {
    %c0 = arith.constant 0 : index
    %c0_0 = arith.constant 0 : index
    %0 = vector.load %arg1[%c0, %c0_0] : memref<8x128xf32, #tpu.memory_space<vmem>>, vector<8x128xf32>
    %c0_1 = arith.constant 0 : index
    %c0_2 = arith.constant 0 : index
    %1 = vector.load %arg2[%c0_1, %c0_2] : memref<8x128xf32, #tpu.memory_space<vmem>>, vector<8x128xf32>
    %2 = arith.addf %0, %1 : vector<8x128xf32>
    %c0_3 = arith.constant 0 : index
    %c0_4 = arith.constant 0 : index
    %3 = vector.load %arg3[%c0_3, %c0_4] : memref<128x128xf32, #tpu.memory_space<vmem>>, vector<128x128xf32>
    %cst = arith.constant dense<0.000000e+00> : vector<8x128xf32>
    %4 = tpu.matmul %2, %3, %cst {dimension_numbers = #tpu.dot_dimension_numbers<[1], [1], [0], [0], [0, 0, 1, 0], [], []>} : vector<8x128xf32>, vector<128x128xf32>, vector<8x128xf32> -> vector<8x128xf32>
    %c0_5 = arith.constant 0 : index
    %c0_6 = arith.constant 0 : index
    %5 = vector.load %arg4[%c0_5, %c0_6] : memref<8x128xf32, #tpu.memory_space<vmem>>, vector<8x128xf32>
    tpu.vector_store %arg4[%c0_5, %c0_6], %4 {strides = array<i32>} : memref<8x128xf32, #tpu.memory_space<vmem>>, vector<8x128xf32>,
    return
  }
  func.func @transform_0(%arg0: i32) -> (i32, i32) {
    %c0_i32 = arith.constant 0 : i32
    %c0_i32_0 = arith.constant 0 : i32
    return %arg0, %c0_i32 : i32, i32
  }
  func.func @transform_1(%arg0: i32) -> (i32, i32) {
    %c0_i32 = arith.constant 0 : i32
    %c0_i32_0 = arith.constant 0 : i32
    return %arg0, %c0_i32 : i32, i32
  }
  func.func @transform_2(%arg0: i32) -> (i32, i32) {
    %c0_i32 = arith.constant 0 : i32
    %c0_i32_0 = arith.constant 0 : i32
    %c0_i32_1 = arith.constant 0 : i32
    return %c0_i32, %c0_i32_0 : i32, i32
  }
  func.func @transform_3(%arg0: i32) -> (i32, i32) {
    %c0_i32 = arith.constant 0 : i32
    %c0_i32_0 = arith.constant 0 : i32
    return %arg0, %c0_i32 : i32, i32
  }
}

</mosaic_0001>

<bundles_post_ra>
// kernel: tpu_custom_call.1
= control target key start
LH: loop header
LB: loop body
LE: loop exit
PB: predicated region body
PF: predicated region fallthrough
CT: control target
= control target key end

     0   :  { %8 = vsyncpa [#allocation3], 0  ;;  %s262_s0 = inlined_call_operand.hbm [shape: f32[8,128], index: 0, kind: input, shape index: {}]   ;;  %s263_s1 = inlined_call_operand.hbm [shape: f32[8,128], index: 1, kind: input, shape index: {}]   ;;  %s264_s2 = inlined_call_operand.hbm [shape: f32[128,128], index: 2, kind: input, shape index: {}]   ;;  %s265_s3 = inlined_call_operand.hbm [shape: f32[8,128], index: 3, kind: output, shape index: {}]  }
   0x1   :  { %9 = vsyncpa [#allocation6], 0  ;;  %s27_s14 = sshll.u32 %s263_s1, 4  ;;  %s28_s14 = int_to_ptr.hbm [resolvable:$true] %s27_s14 }
   0x2   :  { %10 = vsyncpa [#allocation4], 0  ;;  %s224_s15 = smov [#allocation5]   ;;  %s16_s19 = sshll.u32 %s262_s0, 4  ;;  %s17_s19 = int_to_ptr.hbm [resolvable:$true] %s16_s19 }
   0x3   :  { %s29_s16 = sshll.u32 %s224_s15, 4  ;;  %s225_s20 = smov [#allocation2]   ;;  %s30_s16 = int_to_ptr.vmem [resolvable:$true] %s29_s16 }
   0x4   :  { %32 = dma.hbm_to_vmem [thread:$0]  %s28_s14, 128, %s30_s16, [#allocation6]  }
   0x5   :  { %s18_s21 = sshll.u32 %s225_s20, 4  ;;  %s37_s24 = sshll.u32 %s264_s2, 4  ;;  %s19_s21 = int_to_ptr.vmem [resolvable:$true] %s18_s21  ;;  %s38_s24 = int_to_ptr.hbm [resolvable:$true] %s37_s24 }
   0x6   :  { %21 = dma.hbm_to_vmem [thread:$0]  %s17_s19, 128, %s19_s21, [#allocation3]  }
   0x7   :  { %s226_s1 = smov [#allocation7]   ;;  %s227_s26 = smov 128  }
   0x8   :  { %s39_s25 = sshll.u32 %s226_s1, 4  ;;  %s228_s27 = smov 8   ;;  %s40_s25 = int_to_ptr.vmem [resolvable:$true] %s39_s25 }
   0x9   :  { %45 = dma.hbm_to_vmem [thread:$0]  %s38_s24, 2048, %s40_s25, [#allocation6], %s227_s26, %s227_s26, %s228_s27  }
   0xa   :  { %218 = dma.done.wait [#allocation3], 128  }
   0xb   :  { %219 = vsyncadd [#allocation3], 4294967168 }
   0xc   :  { %220 = dma.done.wait [#allocation6], 2176  }
   0xd   :  { %221 = vsyncadd [#allocation6], 4294965120  ;;  %v76_v0 = vld [vmem:[#allocation7 + $0x78] sm:$0xff]  ;;  %v75_v1 = vld [vmem:[#allocation7 + $0x70] sm:$0xff]  ;;  %s229_s0 = smov [#allocation8]   ;;  %s105_s30 = sshll.u32 %s265_s3, 4  ;;  %s106_s30 = int_to_ptr.hbm [resolvable:$true] %s105_s30 }
   0xe   :  { %77 = vmatpush.xpose.msra.mxu0 %v76_v0  ;;  %v74_v2 = vld [vmem:[#allocation7 + $0x68] sm:$0xff]  ;;  %v73_v3 = vld [vmem:[#allocation7 + $0x60] sm:$0xff]  ;;  %v72_v4 = vld [vmem:[#allocation7 + $0x58] sm:$0xff]  ;;  %s103_s2 = sshll.u32 %s229_s0, 4  ;;  %s104_s2 = int_to_ptr.vmem [resolvable:$true] %s103_s2 }
   0xf   :  { %v71_v5 = vld [vmem:[#allocation7 + $0x50] sm:$0xff]  ;;  %v70_v6 = vld [vmem:[#allocation7 + $0x48] sm:$0xff]  ;;  %v69_v7 = vld [vmem:[#allocation7 + $0x40] sm:$0xff] }
  0x10   :  { %v68_v8 = vld [vmem:[#allocation7 + $0x38] sm:$0xff]  ;;  %v67_v9 = vld [vmem:[#allocation7 + $0x30] sm:$0xff]  ;;  %v66_v10 = vld [vmem:[#allocation7 + $0x28] sm:$0xff] }
  0x11   :  { %v65_v11 = vld [vmem:[#allocation7 + $0x20] sm:$0xff]  ;;  %v64_v12 = vld [vmem:[#allocation7 + $0x18] sm:$0xff]  ;;  %v63_v13 = vld [vmem:[#allocation7 + $0x10] sm:$0xff] }
  0x12   :  { %78 = vmatpush.xpose.msra.mxu0 %v75_v1  ;;  %v62_v14 = vld [vmem:[#allocation7 + $0x8] sm:$0xff]  ;;  %v58_v15 = vld [vmem:[#allocation2] sm:$0xff]  ;;  %v59_v16 = vld [vmem:[#allocation5] sm:$0xff] }
  0x13   :  { %v61_v17 = vld [vmem:[#allocation7] sm:$0xff]  ;;  %v60_v18 = vadd.f32 %v59_v16, %v58_v15 }
  0x16   :  { %79 = vmatpush.xpose.msra.mxu0 %v74_v2 }
  0x1a   :  { %80 = vmatpush.xpose.msra.mxu0 %v73_v3 }
  0x1e   :  { %81 = vmatpush.xpose.msra.mxu0 %v72_v4 }
  0x22   :  { %82 = vmatpush.xpose.msra.mxu0 %v71_v5 }
  0x26   :  { %83 = vmatpush.xpose.msra.mxu0 %v70_v6 }
  0x2a   :  { %84 = vmatpush.xpose.msra.mxu0 %v69_v7 }
  0x2e   :  { %85 = vmatpush.xpose.msra.mxu0 %v68_v8 }
  0x32   :  { %86 = vmatpush.xpose.msra.mxu0 %v67_v9 }
  0x36   :  { %87 = vmatpush.xpose.msra.mxu0 %v66_v10 }
  0x3a   :  { %88 = vmatpush.xpose.msra.mxu0 %v65_v11 }
  0x3e   :  { %89 = vmatpush.xpose.msra.mxu0 %v64_v12 }
  0x42   :  { %90 = vmatpush.xpose.msra.mxu0 %v63_v13 }
  0x46   :  { %91 = vmatpush.xpose.msra.mxu0 %v62_v14 }
  0x4a   :  { %92 = vmatpush.xpose.msra.mxu0 %v61_v17 }
  0x4d   :  { %93 = vmatmul.f32.vlgmr.msra.gmra.mxu0 %v60_v18 }
  0xca   :  { %v94_v19 = vpop.f32.mrf.mxu0 }
  0xcb   :  { %97 = vst [vmem:[#allocation8] sm:$0xff] %v94_v19 }
  0xcc   :  { %108 = dma.vmem_to_hbm [thread:$0]  %s104_s2, 128, %s106_s30, [#allocation4]  }
  0xcd   :  { %222 = dma.done.wait [#allocation4], 128  }
  0xce   :  { %223 = vsyncadd [#allocation4], 4294967168 }
  0xcf   :  { %113 = vsyncpa [#allocation3], 1 }
  0xd0   :  { %114 = vsyncpa [#allocation6], 1 }
  0xd1   :  { %115 = vsyncpa [#allocation4], 1 }

</bundles_post_ra>
